<compile_context>
chip_gen: v6e
topology: v6e:2x2x1
jax: 0.10.0
libtpu: 0.0.40
codegen_flags: <defaults>
</compile_context>

<pallas_src>
import jax
import jax.numpy as jnp
import numpy as np
from jax import lax
from jax.experimental import pallas as pl
from jax.experimental.pallas import tpu as pltpu

N_PLAYERS = 30
N_COLS = 4


def bt_kernel(x_ref, emb_ref, o_ref):
    """One grid step on a lane-dense flattened tile.

    x_ref  : (TR, 128) int32   flattened (batch-major, column-minor) indices
    emb_ref: (30,)     float32 embedding table, resident in SMEM
    o_ref  : (TR, 128) float32 flattened output, same layout as x
    """
    xf = x_ref[...]

    # ---- Embedding gather: compare/select chain against SMEM scalars.
    # Out-of-range indices (incl. the zero padding) give strength emb[0]/0
    # consistently and are sliced away by the wrapper.
    s = jnp.zeros(xf.shape, jnp.float32)
    for p in range(N_PLAYERS):
        s = jnp.where(xf == p, emb_ref[p], s)

    # ---- Group-of-4 lane sum, then out = 4*s - group_sum.
    # Two-stage butterfly using symmetric (shift k and 128-k) lane rotates of
    # parity-masked copies: exact f32, rotate-direction agnostic, and the
    # wrapped-around lanes are always masked to zero (128 % 4 == 0).
    lane = lax.broadcasted_iota(jnp.int32, xf.shape, 1)

    # Stage 1: sum within pairs (lanes 2k, 2k+1).
    in_a = ((lane >> 1) & 1) == 0                       # even pair index
    s_a = jnp.where(in_a, s, 0.0)
    s_b = s - s_a
    n_a = pltpu.roll(s_a, 1, axis=1) + pltpu.roll(s_a, 127, axis=1)
    n_b = pltpu.roll(s_b, 1, axis=1) + pltpu.roll(s_b, 127, axis=1)
    pair = s + jnp.where(in_a, n_a, n_b)

    # Stage 2: sum within quads (lanes 4k .. 4k+3) == one batch row.
    in_c = ((lane >> 2) & 1) == 0                       # even quad index
    p_c = jnp.where(in_c, pair, 0.0)
    p_d = pair - p_c
    m_c = pltpu.roll(p_c, 2, axis=1) + pltpu.roll(p_c, 126, axis=1)
    m_d = pltpu.roll(p_d, 2, axis=1) + pltpu.roll(p_d, 126, axis=1)
    quad = pair + jnp.where(in_c, m_c, m_d)

    o_ref[...] = 4.0 * s - quad


def bt_forward(x, emb_weight, *, block_rows=512):
    """x: (B, 4) integer player ids; emb_weight: (N_PLAYERS, 1) float32.

    Returns (B, 4) float32 matching the PyTorch module.
    """
    B = x.shape[0]
    emb = emb_weight.reshape(-1).astype(jnp.float32)            # (30,)

    # Free reshape to a lane-dense (rows, 128) slab -- no HBM transposes.
    n_elems = B * N_COLS
    rows = pl.cdiv(n_elems, 128)

    # Tile rows: multiple of 8 sublanes, capped at block_rows, and sized so
    # the grid has >= 2 steps when the problem allows (v7x megacore).
    tr = min(block_rows, max(8, pl.cdiv(pl.cdiv(rows, 2), 8) * 8))
    rows_pad = pl.cdiv(rows, tr) * tr

    xf = x.reshape(-1).astype(jnp.int32)
    xf = jnp.pad(xf, (0, rows_pad * 128 - n_elems)).reshape(rows_pad, 128)

    out = pl.pallas_call(
        bt_kernel,
        out_shape=jax.ShapeDtypeStruct((rows_pad, 128), jnp.float32),
        grid=(rows_pad // tr,),
        in_specs=[
            pl.BlockSpec((tr, 128), lambda i: (i, 0)),                # indices
            pl.BlockSpec(memory_space=pltpu.MemorySpace.SMEM),        # table
        ],
        out_specs=pl.BlockSpec((tr, 128), lambda i: (i, 0)),
        compiler_params=pltpu.CompilerParams(
            dimension_semantics=("parallel",)),
    )(xf, emb)

    return out.reshape(-1)[:n_elems].reshape(B, N_COLS)


if __name__ == "__main__":
    key = jax.random.PRNGKey(0)
    k_emb, k_x = jax.random.split(key)

    # Deterministic parameter init (Embedding(30, 1) weight).
    emb_weight = jax.random.normal(k_emb, (N_PLAYERS, 1), dtype=jnp.float32)

    # Small batch of index rows, each row has 4 player ids.
    B = 8
    x = jax.random.randint(k_x, (B, N_COLS), 0, N_PLAYERS, dtype=jnp.int32)

    out = jax.block_until_ready(bt_forward(x, emb_weight))

    # Independent host-side f32 reference (no TPU matmul precision caveats).
    strength = np.asarray(emb_weight)[np.asarray(x), 0]                 # (B, 4)
    transform = 4.0 * np.eye(N_COLS, dtype=np.float32) - np.ones(
        (N_COLS, N_COLS), np.float32)
    expected = strength @ transform

    assert out.shape == (B, N_COLS)
    err = float(np.max(np.abs(np.asarray(out) - expected)))
    assert err < 1e-5, f"mismatch: max abs err {err}"
    print("KERNEL_OK")
</pallas_src>

<mosaic_0001>
module attributes {stable_mosaic.version = 11 : i64} {
  func.func @bt_kernel(%arg0: i32, %arg1: memref<8x128xi32, #tpu.memory_space<vmem>>, %arg2: memref<30xf32, #tpu.memory_space<smem>>, %arg3: memref<8x128xf32, #tpu.memory_space<vmem>>) attributes {dimension_semantics = [#tpu.dimension_semantics<parallel>], iteration_bounds = array<i64: 1>, scalar_prefetch = 0 : i64, scratch_operands = 0 : i64, tpu.core_type = #tpu.core_type<tc>, window_params = [{transform_indices = @transform_0, window_bounds = array<i64: 8, 128>}, {transform_indices = @transform_1, window_bounds = array<i64: 30>}, {transform_indices = @transform_2, window_bounds = array<i64: 8, 128>}]} {
    %c0 = arith.constant 0 : index
    %c0_0 = arith.constant 0 : index
    %0 = vector.load %arg1[%c0, %c0_0] : memref<8x128xi32, #tpu.memory_space<vmem>>, vector<8x128xi32>
    %cst = arith.constant 0.000000e+00 : f32
    %1 = vector.broadcast %cst : f32 to vector<8x128xf32>
    %c0_i32 = arith.constant 0 : i32
    %2 = vector.broadcast %c0_i32 : i32 to vector<8x128xi32>
    %3 = arith.cmpi eq, %0, %2 : vector<8x128xi32>
    %c0_1 = arith.constant 0 : index
    %4 = memref.load %arg2[%c0_1] : memref<30xf32, #tpu.memory_space<smem>>
    %5 = vector.broadcast %4 : f32 to vector<8x128xf32>
    %6 = arith.select %3, %5, %1 : vector<8x128xi1>, vector<8x128xf32>
    %c1_i32 = arith.constant 1 : i32
    %7 = vector.broadcast %c1_i32 : i32 to vector<8x128xi32>
    %8 = arith.cmpi eq, %0, %7 : vector<8x128xi32>
    %c1 = arith.constant 1 : index
    %9 = memref.load %arg2[%c1] : memref<30xf32, #tpu.memory_space<smem>>
    %10 = vector.broadcast %9 : f32 to vector<8x128xf32>
    %11 = arith.select %8, %10, %6 : vector<8x128xi1>, vector<8x128xf32>
    %c2_i32 = arith.constant 2 : i32
    %12 = vector.broadcast %c2_i32 : i32 to vector<8x128xi32>
    %13 = arith.cmpi eq, %0, %12 : vector<8x128xi32>
    %c2 = arith.constant 2 : index
    %14 = memref.load %arg2[%c2] : memref<30xf32, #tpu.memory_space<smem>>
    %15 = vector.broadcast %14 : f32 to vector<8x128xf32>
    %16 = arith.select %13, %15, %11 : vector<8x128xi1>, vector<8x128xf32>
    %c3_i32 = arith.constant 3 : i32
    %17 = vector.broadcast %c3_i32 : i32 to vector<8x128xi32>
    %18 = arith.cmpi eq, %0, %17 : vector<8x128xi32>
    %c3 = arith.constant 3 : index
    %19 = memref.load %arg2[%c3] : memref<30xf32, #tpu.memory_space<smem>>
    %20 = vector.broadcast %19 : f32 to vector<8x128xf32>
    %21 = arith.select %18, %20, %16 : vector<8x128xi1>, vector<8x128xf32>
    %c4_i32 = arith.constant 4 : i32
    %22 = vector.broadcast %c4_i32 : i32 to vector<8x128xi32>
    %23 = arith.cmpi eq, %0, %22 : vector<8x128xi32>
    %c4 = arith.constant 4 : index
    %24 = memref.load %arg2[%c4] : memref<30xf32, #tpu.memory_space<smem>>
    %25 = vector.broadcast %24 : f32 to vector<8x128xf32>
    %26 = arith.select %23, %25, %21 : vector<8x128xi1>, vector<8x128xf32>
    %c5_i32 = arith.constant 5 : i32
    %27 = vector.broadcast %c5_i32 : i32 to vector<8x128xi32>
    %28 = arith.cmpi eq, %0, %27 : vector<8x128xi32>
    %c5 = arith.constant 5 : index
    %29 = memref.load %arg2[%c5] : memref<30xf32, #tpu.memory_space<smem>>
    %30 = vector.broadcast %29 : f32 to vector<8x128xf32>
    %31 = arith.select %28, %30, %26 : vector<8x128xi1>, vector<8x128xf32>
    %c6_i32 = arith.constant 6 : i32
    %32 = vector.broadcast %c6_i32 : i32 to vector<8x128xi32>
    %33 = arith.cmpi eq, %0, %32 : vector<8x128xi32>
    %c6 = arith.constant 6 : index
    %34 = memref.load %arg2[%c6] : memref<30xf32, #tpu.memory_space<smem>>
    %35 = vector.broadcast %34 : f32 to vector<8x128xf32>
    %36 = arith.select %33, %35, %31 : vector<8x128xi1>, vector<8x128xf32>
    %c7_i32 = arith.constant 7 : i32
    %37 = vector.broadcast %c7_i32 : i32 to vector<8x128xi32>
    %38 = arith.cmpi eq, %0, %37 : vector<8x128xi32>
    %c7 = arith.constant 7 : index
    %39 = memref.load %arg2[%c7] : memref<30xf32, #tpu.memory_space<smem>>
    %40 = vector.broadcast %39 : f32 to vector<8x128xf32>
    %41 = arith.select %38, %40, %36 : vector<8x128xi1>, vector<8x128xf32>
    %c8_i32 = arith.constant 8 : i32
    %42 = vector.broadcast %c8_i32 : i32 to vector<8x128xi32>
    %43 = arith.cmpi eq, %0, %42 : vector<8x128xi32>
    %c8 = arith.constant 8 : index
    %44 = memref.load %arg2[%c8] : memref<30xf32, #tpu.memory_space<smem>>
    %45 = vector.broadcast %44 : f32 to vector<8x128xf32>
    %46 = arith.select %43, %45, %41 : vector<8x128xi1>, vector<8x128xf32>
    %c9_i32 = arith.constant 9 : i32
    %47 = vector.broadcast %c9_i32 : i32 to vector<8x128xi32>
    %48 = arith.cmpi eq, %0, %47 : vector<8x128xi32>
    %c9 = arith.constant 9 : index
    %49 = memref.load %arg2[%c9] : memref<30xf32, #tpu.memory_space<smem>>
    %50 = vector.broadcast %49 : f32 to vector<8x128xf32>
    %51 = arith.select %48, %50, %46 : vector<8x128xi1>, vector<8x128xf32>
    %c10_i32 = arith.constant 10 : i32
    %52 = vector.broadcast %c10_i32 : i32 to vector<8x128xi32>
    %53 = arith.cmpi eq, %0, %52 : vector<8x128xi32>
    %c10 = arith.constant 10 : index
    %54 = memref.load %arg2[%c10] : memref<30xf32, #tpu.memory_space<smem>>
    %55 = vector.broadcast %54 : f32 to vector<8x128xf32>
    %56 = arith.select %53, %55, %51 : vector<8x128xi1>, vector<8x128xf32>
    %c11_i32 = arith.constant 11 : i32
    %57 = vector.broadcast %c11_i32 : i32 to vector<8x128xi32>
    %58 = arith.cmpi eq, %0, %57 : vector<8x128xi32>
    %c11 = arith.constant 11 : index
    %59 = memref.load %arg2[%c11] : memref<30xf32, #tpu.memory_space<smem>>
    %60 = vector.broadcast %59 : f32 to vector<8x128xf32>
    %61 = arith.select %58, %60, %56 : vector<8x128xi1>, vector<8x128xf32>
    %c12_i32 = arith.constant 12 : i32
    %62 = vector.broadcast %c12_i32 : i32 to vector<8x128xi32>
    %63 = arith.cmpi eq, %0, %62 : vector<8x128xi32>
    %c12 = arith.constant 12 : index
    %64 = memref.load %arg2[%c12] : memref<30xf32, #tpu.memory_space<smem>>
    %65 = vector.broadcast %64 : f32 to vector<8x128xf32>
    %66 = arith.select %63, %65, %61 : vector<8x128xi1>, vector<8x128xf32>
    %c13_i32 = arith.constant 13 : i32
    %67 = vector.broadcast %c13_i32 : i32 to vector<8x128xi32>
    %68 = arith.cmpi eq, %0, %67 : vector<8x128xi32>
    %c13 = arith.constant 13 : index
    %69 = memref.load %arg2[%c13] : memref<30xf32, #tpu.memory_space<smem>>
    %70 = vector.broadcast %69 : f32 to vector<8x128xf32>
    %71 = arith.select %68, %70, %66 : vector<8x128xi1>, vector<8x128xf32>
    %c14_i32 = arith.constant 14 : i32
    %72 = vector.broadcast %c14_i32 : i32 to vector<8x128xi32>
    %73 = arith.cmpi eq, %0, %72 : vector<8x128xi32>
    %c14 = arith.constant 14 : index
    %74 = memref.load %arg2[%c14] : memref<30xf32, #tpu.memory_space<smem>>
    %75 = vector.broadcast %74 : f32 to vector<8x128xf32>
    %76 = arith.select %73, %75, %71 : vector<8x128xi1>, vector<8x128xf32>
    %c15_i32 = arith.constant 15 : i32
    %77 = vector.broadcast %c15_i32 : i32 to vector<8x128xi32>
    %78 = arith.cmpi eq, %0, %77 : vector<8x128xi32>
    %c15 = arith.constant 15 : index
    %79 = memref.load %arg2[%c15] : memref<30xf32, #tpu.memory_space<smem>>
    %80 = vector.broadcast %79 : f32 to vector<8x128xf32>
    %81 = arith.select %78, %80, %76 : vector<8x128xi1>, vector<8x128xf32>
    %c16_i32 = arith.constant 16 : i32
    %82 = vector.broadcast %c16_i32 : i32 to vector<8x128xi32>
    %83 = arith.cmpi eq, %0, %82 : vector<8x128xi32>
    %c16 = arith.constant 16 : index
    %84 = memref.load %arg2[%c16] : memref<30xf32, #tpu.memory_space<smem>>
    %85 = vector.broadcast %84 : f32 to vector<8x128xf32>
    %86 = arith.select %83, %85, %81 : vector<8x128xi1>, vector<8x128xf32>
    %c17_i32 = arith.constant 17 : i32
    %87 = vector.broadcast %c17_i32 : i32 to vector<8x128xi32>
    %88 = arith.cmpi eq, %0, %87 : vector<8x128xi32>
    %c17 = arith.constant 17 : index
    %89 = memref.load %arg2[%c17] : memref<30xf32, #tpu.memory_space<smem>>
    %90 = vector.broadcast %89 : f32 to vector<8x128xf32>
    %91 = arith.select %88, %90, %86 : vector<8x128xi1>, vector<8x128xf32>
    %c18_i32 = arith.constant 18 : i32
    %92 = vector.broadcast %c18_i32 : i32 to vector<8x128xi32>
    %93 = arith.cmpi eq, %0, %92 : vector<8x128xi32>
    %c18 = arith.constant 18 : index
    %94 = memref.load %arg2[%c18] : memref<30xf32, #tpu.memory_space<smem>>
    %95 = vector.broadcast %94 : f32 to vector<8x128xf32>
    %96 = arith.select %93, %95, %91 : vector<8x128xi1>, vector<8x128xf32>
    %c19_i32 = arith.constant 19 : i32
    %97 = vector.broadcast %c19_i32 : i32 to vector<8x128xi32>
    %98 = arith.cmpi eq, %0, %97 : vector<8x128xi32>
    %c19 = arith.constant 19 : index
    %99 = memref.load %arg2[%c19] : memref<30xf32, #tpu.memory_space<smem>>
    %100 = vector.broadcast %99 : f32 to vector<8x128xf32>
    %101 = arith.select %98, %100, %96 : vector<8x128xi1>, vector<8x128xf32>
    %c20_i32 = arith.constant 20 : i32
    %102 = vector.broadcast %c20_i32 : i32 to vector<8x128xi32>
    %103 = arith.cmpi eq, %0, %102 : vector<8x128xi32>
    %c20 = arith.constant 20 : index
    %104 = memref.load %arg2[%c20] : memref<30xf32, #tpu.memory_space<smem>>
    %105 = vector.broadcast %104 : f32 to vector<8x128xf32>
    %106 = arith.select %103, %105, %101 : vector<8x128xi1>, vector<8x128xf32>
    %c21_i32 = arith.constant 21 : i32
    %107 = vector.broadcast %c21_i32 : i32 to vector<8x128xi32>
    %108 = arith.cmpi eq, %0, %107 : vector<8x128xi32>
    %c21 = arith.constant 21 : index
    %109 = memref.load %arg2[%c21] : memref<30xf32, #tpu.memory_space<smem>>
    %110 = vector.broadcast %109 : f32 to vector<8x128xf32>
    %111 = arith.select %108, %110, %106 : vector<8x128xi1>, vector<8x128xf32>
    %c22_i32 = arith.constant 22 : i32
    %112 = vector.broadcast %c22_i32 : i32 to vector<8x128xi32>
    %113 = arith.cmpi eq, %0, %112 : vector<8x128xi32>
    %c22 = arith.constant 22 : index
    %114 = memref.load %arg2[%c22] : memref<30xf32, #tpu.memory_space<smem>>
    %115 = vector.broadcast %114 : f32 to vector<8x128xf32>
    %116 = arith.select %113, %115, %111 : vector<8x128xi1>, vector<8x128xf32>
    %c23_i32 = arith.constant 23 : i32
    %117 = vector.broadcast %c23_i32 : i32 to vector<8x128xi32>
    %118 = arith.cmpi eq, %0, %117 : vector<8x128xi32>
    %c23 = arith.constant 23 : index
    %119 = memref.load %arg2[%c23] : memref<30xf32, #tpu.memory_space<smem>>
    %120 = vector.broadcast %119 : f32 to vector<8x128xf32>
    %121 = arith.select %118, %120, %116 : vector<8x128xi1>, vector<8x128xf32>
    %c24_i32 = arith.constant 24 : i32
    %122 = vector.broadcast %c24_i32 : i32 to vector<8x128xi32>
    %123 = arith.cmpi eq, %0, %122 : vector<8x128xi32>
    %c24 = arith.constant 24 : index
    %124 = memref.load %arg2[%c24] : memref<30xf32, #tpu.memory_space<smem>>
    %125 = vector.broadcast %124 : f32 to vector<8x128xf32>
    %126 = arith.select %123, %125, %121 : vector<8x128xi1>, vector<8x128xf32>
    %c25_i32 = arith.constant 25 : i32
    %127 = vector.broadcast %c25_i32 : i32 to vector<8x128xi32>
    %128 = arith.cmpi eq, %0, %127 : vector<8x128xi32>
    %c25 = arith.constant 25 : index
    %129 = memref.load %arg2[%c25] : memref<30xf32, #tpu.memory_space<smem>>
    %130 = vector.broadcast %129 : f32 to vector<8x128xf32>
    %131 = arith.select %128, %130, %126 : vector<8x128xi1>, vector<8x128xf32>
    %c26_i32 = arith.constant 26 : i32
    %132 = vector.broadcast %c26_i32 : i32 to vector<8x128xi32>
    %133 = arith.cmpi eq, %0, %132 : vector<8x128xi32>
    %c26 = arith.constant 26 : index
    %134 = memref.load %arg2[%c26] : memref<30xf32, #tpu.memory_space<smem>>
    %135 = vector.broadcast %134 : f32 to vector<8x128xf32>
    %136 = arith.select %133, %135, %131 : vector<8x128xi1>, vector<8x128xf32>
    %c27_i32 = arith.constant 27 : i32
    %137 = vector.broadcast %c27_i32 : i32 to vector<8x128xi32>
    %138 = arith.cmpi eq, %0, %137 : vector<8x128xi32>
    %c27 = arith.constant 27 : index
    %139 = memref.load %arg2[%c27] : memref<30xf32, #tpu.memory_space<smem>>
    %140 = vector.broadcast %139 : f32 to vector<8x128xf32>
    %141 = arith.select %138, %140, %136 : vector<8x128xi1>, vector<8x128xf32>
    %c28_i32 = arith.constant 28 : i32
    %142 = vector.broadcast %c28_i32 : i32 to vector<8x128xi32>
    %143 = arith.cmpi eq, %0, %142 : vector<8x128xi32>
    %c28 = arith.constant 28 : index
    %144 = memref.load %arg2[%c28] : memref<30xf32, #tpu.memory_space<smem>>
    %145 = vector.broadcast %144 : f32 to vector<8x128xf32>
    %146 = arith.select %143, %145, %141 : vector<8x128xi1>, vector<8x128xf32>
    %c29_i32 = arith.constant 29 : i32
    %147 = vector.broadcast %c29_i32 : i32 to vector<8x128xi32>
    %148 = arith.cmpi eq, %0, %147 : vector<8x128xi32>
    %c29 = arith.constant 29 : index
    %149 = memref.load %arg2[%c29] : memref<30xf32, #tpu.memory_space<smem>>
    %150 = vector.broadcast %149 : f32 to vector<8x128xf32>
    %151 = arith.select %148, %150, %146 : vector<8x128xi1>, vector<8x128xf32>
    %152 = tpu.iota {dimensions = array<i32: 1>} : vector<8x128xi32>
    %c1_i32_2 = arith.constant 1 : i32
    %153 = vector.broadcast %c1_i32_2 : i32 to vector<8x128xi32>
    %154 = arith.shrsi %152, %153 : vector<8x128xi32>
    %c1_i32_3 = arith.constant 1 : i32
    %155 = vector.broadcast %c1_i32_3 : i32 to vector<8x128xi32>
    %156 = arith.andi %154, %155 : vector<8x128xi32>
    %c0_i32_4 = arith.constant 0 : i32
    %157 = vector.broadcast %c0_i32_4 : i32 to vector<8x128xi32>
    %158 = arith.cmpi eq, %156, %157 : vector<8x128xi32>
    %cst_5 = arith.constant 0.000000e+00 : f32
    %159 = vector.broadcast %cst_5 : f32 to vector<8x128xf32>
    %160 = arith.select %158, %151, %159 : vector<8x128xi1>, vector<8x128xf32>
    %161 = arith.subf %151, %160 : vector<8x128xf32>
    %c1_i32_6 = arith.constant 1 : i32
    %162 = tpu.dynamic_rotate %160 by %c1_i32_6 dim 1 : vector<8x128xf32>, i32 -> vector<8x128xf32>
    %c127_i32 = arith.constant 127 : i32
    %163 = tpu.dynamic_rotate %160 by %c127_i32 dim 1 : vector<8x128xf32>, i32 -> vector<8x128xf32>
    %164 = arith.addf %162, %163 : vector<8x128xf32>
    %c1_i32_7 = arith.constant 1 : i32
    %165 = tpu.dynamic_rotate %161 by %c1_i32_7 dim 1 : vector<8x128xf32>, i32 -> vector<8x128xf32>
    %c127_i32_8 = arith.constant 127 : i32
    %166 = tpu.dynamic_rotate %161 by %c127_i32_8 dim 1 : vector<8x128xf32>, i32 -> vector<8x128xf32>
    %167 = arith.addf %165, %166 : vector<8x128xf32>
    %168 = arith.select %158, %164, %167 : vector<8x128xi1>, vector<8x128xf32>
    %169 = arith.addf %151, %168 : vector<8x128xf32>
    %c2_i32_9 = arith.constant 2 : i32
    %170 = vector.broadcast %c2_i32_9 : i32 to vector<8x128xi32>
    %171 = arith.shrsi %152, %170 : vector<8x128xi32>
    %c1_i32_10 = arith.constant 1 : i32
    %172 = vector.broadcast %c1_i32_10 : i32 to vector<8x128xi32>
    %173 = arith.andi %171, %172 : vector<8x128xi32>
    %c0_i32_11 = arith.constant 0 : i32
    %174 = vector.broadcast %c0_i32_11 : i32 to vector<8x128xi32>
    %175 = arith.cmpi eq, %173, %174 : vector<8x128xi32>
    %cst_12 = arith.constant 0.000000e+00 : f32
    %176 = vector.broadcast %cst_12 : f32 to vector<8x128xf32>
    %177 = arith.select %175, %169, %176 : vector<8x128xi1>, vector<8x128xf32>
    %178 = arith.subf %169, %177 : vector<8x128xf32>
    %c2_i32_13 = arith.constant 2 : i32
    %179 = tpu.dynamic_rotate %177 by %c2_i32_13 dim 1 : vector<8x128xf32>, i32 -> vector<8x128xf32>
    %c126_i32 = arith.constant 126 : i32
    %180 = tpu.dynamic_rotate %177 by %c126_i32 dim 1 : vector<8x128xf32>, i32 -> vector<8x128xf32>
    %181 = arith.addf %179, %180 : vector<8x128xf32>
    %c2_i32_14 = arith.constant 2 : i32
    %182 = tpu.dynamic_rotate %178 by %c2_i32_14 dim 1 : vector<8x128xf32>, i32 -> vector<8x128xf32>
    %c126_i32_15 = arith.constant 126 : i32
    %183 = tpu.dynamic_rotate %178 by %c126_i32_15 dim 1 : vector<8x128xf32>, i32 -> vector<8x128xf32>
    %184 = arith.addf %182, %183 : vector<8x128xf32>
    %185 = arith.select %175, %181, %184 : vector<8x128xi1>, vector<8x128xf32>
    %186 = arith.addf %169, %185 : vector<8x128xf32>
    %cst_16 = arith.constant 4.000000e+00 : f32
    %187 = vector.broadcast %cst_16 : f32 to vector<8x128xf32>
    %188 = arith.mulf %187, %151 : vector<8x128xf32>
    %189 = arith.subf %188, %186 : vector<8x128xf32>
    %c0_17 = arith.constant 0 : index
    %c0_18 = arith.constant 0 : index
    %190 = vector.load %arg3[%c0_17, %c0_18] : memref<8x128xf32, #tpu.memory_space<vmem>>, vector<8x128xf32>
    tpu.vector_store %arg3[%c0_17, %c0_18], %189 {strides = array<i32>} : memref<8x128xf32, #tpu.memory_space<vmem>>, vector<8x128xf32>,
    return
  }
  func.func @transform_0(%arg0: i32) -> (i32, i32) {
    %c0_i32 = arith.constant 0 : i32
    %c0_i32_0 = arith.constant 0 : i32
    return %arg0, %c0_i32 : i32, i32
  }
  func.func @transform_1(%arg0: i32) -> i32 {
    %c0_i32 = arith.constant 0 : i32
    %c0_i32_0 = arith.constant 0 : i32
    return %c0_i32 : i32
  }
  func.func @transform_2(%arg0: i32) -> (i32, i32) {
    %c0_i32 = arith.constant 0 : i32
    %c0_i32_0 = arith.constant 0 : i32
    return %arg0, %c0_i32 : i32, i32
  }
}

</mosaic_0001>

<bundles_post_ra>
// kernel: tpu_custom_call.1
= control target key start
LH: loop header
LB: loop body
LE: loop exit
PB: predicated region body
PF: predicated region fallthrough
CT: control target
= control target key end

     0   :  { %7 = vsyncpa [#allocation3], 0  ;;  %s374_s0 = inlined_call_operand.hbm [shape: s32[8,128], index: 0, kind: input, shape index: {}]   ;;  %s375_s1 = inlined_call_operand.vmem [shape: f32[30], index: 1, kind: input, shape index: {}]   ;;  %s376_s2 = inlined_call_operand.hbm [shape: f32[8,128], index: 2, kind: output, shape index: {}]  }
   0x1   :  { %8 = vsyncpa [#allocation5], 0 }
   0x2   :  { %9 = vsyncpa [#allocation4], 0  ;;  %s26_s11 = sshll.u32 %s375_s1, 4  ;;  %s307_s12 = smov [#allocation2]   ;;  %s27_s11 = int_to_ptr.vmem [resolvable:$true] %s26_s11 }
   0x3   :  { %s16_s13 = sshll.u32 %s307_s12, 4  ;;  %s17_s13 = int_to_ptr.vmem [resolvable:$true] %s16_s13 }
   0x4   :  { %s257_s14 = scalar_lea.vmem %s17_s13, 128  ;;  %p262_p1 = scmp.lt.s32.totalorder %s17_s13, %s17_s13 }
   0x5   :  { %p258_p0 = scmp.ne.s32.totalorder %s17_s13, %s257_s14  ;;  %p263_p2 = scmp.lt.s32.totalorder %s257_s14, %s257_s14 }
   0x7   :  { %p264_p3 = por %p263_p2, %p262_p1 }
   0x9   :  { %p265_p4 = pnand %p264_p3, %p258_p0 }
   0xb   :  { %268 = shalt.err (!%p265_p4)
}
   0xc   :  { %19 = dma.hbm_to_vmem [thread:$0]  %s374_s0, 128, %s17_s13, [#allocation3]  }
   0xd   :  { %s269_s17 = scalar_lea.vmem %s27_s11, 16  ;;  %p274_p6 = scmp.lt.s32.totalorder %s27_s11, %s27_s11 }
   0xe   :  { %p270_p5 = scmp.ne.s32.totalorder %s27_s11, %s269_s17  ;;  %p275_p7 = scmp.lt.s32.totalorder %s269_s17, %s269_s17 }
  0x10   :  { %p276_p8 = por %p275_p7, %p274_p6 }
  0x12   :  { %p277_p9 = pnand %p276_p8, %p270_p5 }
  0x14   :  { %280 = shalt.err (!%p277_p9)
}
  0x15   :  { %s308_s1 = smov [#allocation6]  }
  0x16   :  { %29 = dma.vmem_to_smem %s27_s11, 16, %s308_s1, [#allocation5]  }
  0x17   :  { %301 = dma.done.wait [#allocation3], 128  }
  0x18   :  { %302 = vsyncadd [#allocation3], 4294967168 }
  0x19   :  { %303 = dma.done.wait [#allocation5], 16  }
  0x1a   :  { %304 = vsyncadd [#allocation5], 4294967280 }
  0x1b   :  { %36 = sfence }
  0x1c   :  { %s39_s18 = sld [smem:[#allocation6]]  ;;  %v335_v0 = vld [vmem:[#allocation2] sm:$0xff]  ;;  %v158_v26 = vlaneseq }
  0x1d   :  { %s213_s19 = sld [smem:[#allocation6 + $0x1]]  ;;  %vm38_vm0 = vcmp.eq.s32.totalorder %v335_v0, 0  ;;  %vm42_vm1 = vcmp.eq.s32.totalorder %v335_v0, 1  ;;  %vm46_vm2 = vcmp.eq.s32.totalorder %v335_v0, 2  ;;  %vm50_vm3 = vcmp.eq.s32.totalorder %v335_v0, 3 }
  0x1e   :  { %s214_s20 = sld [smem:[#allocation6 + $0x2]]  ;;  %vm54_vm4 = vcmp.eq.s32.totalorder %v335_v0, 4  ;;  %vm58_vm5 = vcmp.eq.s32.totalorder %v335_v0, 5  ;;  %vm62_vm6 = vcmp.eq.s32.totalorder %v335_v0, 6  ;;  %vm66_vm7 = vcmp.eq.s32.totalorder %v335_v0, 7 }
  0x1f   :  { %s215_s0 = sld [smem:[#allocation6 + $0x3]]  ;;  %vm70_vm8 = vcmp.eq.s32.totalorder %v335_v0, 8  ;;  %vm74_vm9 = vcmp.eq.s32.totalorder %v335_v0, 9  ;;  %vm78_vm10 = vcmp.eq.s32.totalorder %v335_v0, 10  ;;  %vm82_vm11 = vcmp.eq.s32.totalorder %v335_v0, 11 }
  0x20   :  { %s216_s21 = sld [smem:[#allocation6 + $0x4]]  ;;  %vm86_vm12 = vcmp.eq.s32.totalorder %v335_v0, 12  ;;  %vm90_vm13 = vcmp.eq.s32.totalorder %v335_v0, 13  ;;  %vm94_vm14 = vcmp.eq.s32.totalorder %v335_v0, 14  ;;  %vm98_vm15 = vcmp.eq.s32.totalorder %v335_v0, 15 }
  0x21   :  { %s217_s22 = sld [smem:[#allocation6 + $0x5]]  ;;  %v159_v35 = vand.u32 127, %v158_v26 }
  0x22   :  { %v40_v1 = vstv %s39_s18  ;;  %s218_s23 = sld [smem:[#allocation6 + $0x6]]  ;;  %s309_s18 = smov 1  }
  0x23   :  { %v41_v2 = vsel %vm38_vm0, %v40_v1, 0.0  ;;  %v44_v3 = vstv %s213_s19  ;;  %s219_s24 = sld [smem:[#allocation6 + $0x7]]  ;;  %vm102_vm0 = vcmp.eq.s32.totalorder %v335_v0, 16  ;;  %v160_v44 = vshra.s32 %v159_v35, 1  ;;  %s310_s19 = smov 127  }
  0x24   :  { %v45_v4 = vsel %vm42_vm1, %v44_v3, %v41_v2  ;;  %v48_v5 = vstv %s214_s20  ;;  %s220_s25 = sld [smem:[#allocation6 + $0x8]]  ;;  %vm106_vm1 = vcmp.eq.s32.totalorder %v335_v0, 17  ;;  %s311_s20 = smov 126  }
  0x25   :  { %v49_v6 = vsel %vm46_vm2, %v48_v5, %v45_v4  ;;  %v52_v7 = vstv %s215_s0  ;;  %s221_s26 = sld [smem:[#allocation6 + $0x9]]  ;;  %vm110_vm2 = vcmp.eq.s32.totalorder %v335_v0, 18  ;;  %v161_v53 = vand.u32 1, %v160_v44  ;;  %s312_s0 = smov 2  }
  0x26   :  { %v53_v8 = vsel %vm50_vm3, %v52_v7, %v49_v6  ;;  %v56_v9 = vstv %s216_s21  ;;  %s222_s27 = sld [smem:[#allocation6 + $0xa]]  ;;  %vm114_vm3 = vcmp.eq.s32.totalorder %v335_v0, 19  ;;  %v177_v5 = vshra.s32 %v159_v35, 2  ;;  %s313_s21 = smov [#allocation7]  }
  0x27   :  { %v57_v10 = vsel %vm54_vm4, %v56_v9, %v53_v8  ;;  %v60_v11 = vstv %s217_s22  ;;  %s223_s28 = sld [smem:[#allocation6 + $0xb]]  ;;  %vm118_vm4 = vcmp.eq.s32.totalorder %v335_v0, 20  ;;  %s203_s22 = sshll.u32 %s313_s21, 4  ;;  %s204_s22 = int_to_ptr.vmem [resolvable:$true] %s203_s22 }
  0x28   :  { %v61_v12 = vsel %vm58_vm5, %v60_v11, %v57_v10  ;;  %v64_v13 = vstv %s218_s23  ;;  %s224_s29 = sld [smem:[#allocation6 + $0xc]]  ;;  %vm122_vm5 = vcmp.eq.s32.totalorder %v335_v0, 21  ;;  %s281_s23 = scalar_lea.vmem %s204_s22, 128 }
  0x29   :  { %v65_v14 = vsel %vm62_vm6, %v64_v13, %v61_v12  ;;  %v68_v15 = vstv %s219_s24  ;;  %s225_s30 = sld [smem:[#allocation6 + $0xd]]  ;;  %vm126_vm6 = vcmp.eq.s32.totalorder %v335_v0, 22  ;;  %p282_p10 = scmp.ne.s32.totalorder %s204_s22, %s281_s23 }
  0x2a   :  { %v69_v16 = vsel %vm66_vm7, %v68_v15, %v65_v14  ;;  %v72_v17 = vstv %s220_s25  ;;  %s226_s3 = sld [smem:[#allocation6 + $0xe]]  ;;  %vm130_vm7 = vcmp.eq.s32.totalorder %v335_v0, 23  ;;  %p286_p11 = scmp.lt.s32.totalorder %s204_s22, %s204_s22 }
  0x2b   :  { %v73_v18 = vsel %vm70_vm8, %v72_v17, %v69_v16  ;;  %v76_v19 = vstv %s221_s26  ;;  %s227_s4 = sld [smem:[#allocation6 + $0xf]]  ;;  %vm134_vm8 = vcmp.eq.s32.totalorder %v335_v0, 24  ;;  %p287_p12 = scmp.lt.s32.totalorder %s281_s23, %s281_s23 }
  0x2c   :  { %v77_v20 = vsel %vm74_vm9, %v76_v19, %v73_v18  ;;  %v80_v21 = vstv %s222_s27  ;;  %s228_s5 = sld [smem:[#allocation6 + $0x10]]  ;;  %vm138_vm9 = vcmp.eq.s32.totalorder %v335_v0, 25 }
  0x2d   :  { %v81_v22 = vsel %vm78_vm10, %v80_v21, %v77_v20  ;;  %v84_v23 = vstv %s223_s28  ;;  %s229_s6 = sld [smem:[#allocation6 + $0x11]]  ;;  %vm142_vm10 = vcmp.eq.s32.totalorder %v335_v0, 26  ;;  %p288_p13 = por %p287_p12, %p286_p11 }
  0x2e   :  { %v85_v24 = vsel %vm82_vm11, %v84_v23, %v81_v22  ;;  %v88_v25 = vstv %s224_s29  ;;  %s230_s7 = sld [smem:[#allocation6 + $0x12]]  ;;  %vm146_vm11 = vcmp.eq.s32.totalorder %v335_v0, 27 }
  0x2f   :  { %v89_v27 = vsel %vm86_vm12, %v88_v25, %v85_v24  ;;  %v92_v28 = vstv %s225_s30  ;;  %s231_s8 = sld [smem:[#allocation6 + $0x13]]  ;;  %vm150_vm12 = vcmp.eq.s32.totalorder %v335_v0, 28  ;;  %p289_p0 = pnand %p288_p13, %p282_p10 }
  0x30   :  { %v93_v29 = vsel %vm90_vm13, %v92_v28, %v89_v27  ;;  %v96_v30 = vstv %s226_s3  ;;  %s232_s9 = sld [smem:[#allocation6 + $0x14]]  ;;  %vm154_vm13 = vcmp.eq.s32.totalorder %v335_v0, 29  ;;  %v178_v0 = vand.u32 1, %v177_v5 }
  0x31   :  { %v97_v31 = vsel %vm94_vm14, %v96_v30, %v93_v29  ;;  %v100_v32 = vstv %s227_s4  ;;  %s233_s10 = sld [smem:[#allocation6 + $0x15]]  ;;  %vm162_vm14 = vcmp.eq.s32.totalorder %v161_v53, 0 }
  0x32   :  { %v101_v33 = vsel %vm98_vm15, %v100_v32, %v97_v31  ;;  %v104_v34 = vstv %s228_s5  ;;  %s234_s11 = sld [smem:[#allocation6 + $0x16]]  ;;  %vm179_vm15 = vcmp.eq.s32.totalorder %v178_v0, 0 }
  0x33   :  { %v105_v36 = vsel %vm102_vm0, %v104_v34, %v101_v33  ;;  %v108_v37 = vstv %s229_s6  ;;  %s235_s12 = sld [smem:[#allocation6 + $0x17]] }
  0x34   :  { %v109_v38 = vsel %vm106_vm1, %v108_v37, %v105_v36  ;;  %v112_v39 = vstv %s230_s7  ;;  %s236_s13 = sld [smem:[#allocation6 + $0x18]] }
  0x35   :  { %v113_v40 = vsel %vm110_vm2, %v112_v39, %v109_v38  ;;  %v116_v41 = vstv %s231_s8  ;;  %s237_s14 = sld [smem:[#allocation6 + $0x19]] }
  0x36   :  { %v117_v42 = vsel %vm114_vm3, %v116_v41, %v113_v40  ;;  %v120_v43 = vstv %s232_s9  ;;  %s238_s15 = sld [smem:[#allocation6 + $0x1a]] }
  0x37   :  { %v121_v45 = vsel %vm118_vm4, %v120_v43, %v117_v42  ;;  %v124_v46 = vstv %s233_s10  ;;  %s239_s16 = sld [smem:[#allocation6 + $0x1b]] }
  0x38   :  { %v125_v47 = vsel %vm122_vm5, %v124_v46, %v121_v45  ;;  %v128_v48 = vstv %s234_s11  ;;  %s240_s17 = sld [smem:[#allocation6 + $0x1c]] }
  0x39   :  { %v129_v49 = vsel %vm126_vm6, %v128_v48, %v125_v47  ;;  %v132_v50 = vstv %s235_s12  ;;  %s241_s1 = sld [smem:[#allocation6 + $0x1d]] }
  0x3a   :  { %v133_v51 = vsel %vm130_vm7, %v132_v50, %v129_v49  ;;  %v136_v52 = vstv %s236_s13 }
  0x3b   :  { %v137_v54 = vsel %vm134_vm8, %v136_v52, %v133_v51  ;;  %v140_v55 = vstv %s237_s14 }
  0x3c   :  { %v141_v56 = vsel %vm138_vm9, %v140_v55, %v137_v54  ;;  %v144_v57 = vstv %s238_s15 }
  0x3d   :  { %v145_v58 = vsel %vm142_vm10, %v144_v57, %v141_v56  ;;  %v148_v59 = vstv %s239_s16 }
  0x3e   :  { %v149_v60 = vsel %vm146_vm11, %v148_v59, %v145_v58  ;;  %v152_v61 = vstv %s240_s17 }
  0x3f   :  { %v153_v62 = vsel %vm150_vm12, %v152_v61, %v149_v60  ;;  %v156_v63 = vstv %s241_s1 }
  0x40   :  { %v157_v1 = vsel %vm154_vm13, %v156_v63, %v153_v62 }
  0x41   :  { %v163_v2 = vsel %vm162_vm14, %v157_v1, 0.0  ;;  %v194_v21 = vmul.f32 4.0, %v157_v1 }
  0x42   :  { %165 = vrot.lane.b32.xlu0 %v163_v2, %s309_s18  ;;  %v164_v3 = vsub.f32 %v157_v1, %v163_v2 }
  0x44   :  { %170 = vrot.lane.b32.xlu1 %v164_v3, %s309_s18 }
  0x46   :  { %167 = vrot.lane.b32.xlu0 %v163_v2, %s310_s19 }
  0x48   :  { %172 = vrot.lane.b32.xlu1 %v164_v3, %s310_s19 }
  0xb4   :  { %v166_v4 = vpop.permute.xlu0 %165 }
  0xb6   :  { %v171_v6 = vpop.permute.xlu1 %170 }
  0xb8   :  { %v168_v7 = vpop.permute.xlu0 %167 }
  0xb9   :  { %v169_v9 = vadd.f32 %v168_v7, %v166_v4 }
  0xba   :  { %v173_v8 = vpop.permute.xlu1 %172 }
  0xbb   :  { %v174_v10 = vadd.f32 %v173_v8, %v171_v6 }
  0xbd   :  { %v175_v11 = vsel %vm162_vm14, %v169_v9, %v174_v10 }
  0xbe   :  { %v176_v12 = vadd.f32 %v175_v11, %v157_v1 }
  0xc0   :  { %v180_v13 = vsel %vm179_vm15, %v176_v12, 0.0 }
  0xc1   :  { %184 = vrot.lane.b32.xlu1 %v180_v13, %s311_s20  ;;  %182 = vrot.lane.b32.xlu0 %v180_v13, %s312_s0  ;;  %v181_v14 = vsub.f32 %v176_v12, %v180_v13 }
  0xc5   :  { %189 = vrot.lane.b32.xlu1 %v181_v14, %s311_s20  ;;  %187 = vrot.lane.b32.xlu0 %v181_v14, %s312_s0 }
 0x133   :  { %v185_v15 = vpop.permute.xlu1 %184  ;;  %v183_v16 = vpop.permute.xlu0 %182 }
 0x134   :  { %v186_v19 = vadd.f32 %v185_v15, %v183_v16 }
 0x137   :  { %v190_v17 = vpop.permute.xlu1 %189  ;;  %v188_v18 = vpop.permute.xlu0 %187 }
 0x138   :  { %v191_v20 = vadd.f32 %v190_v17, %v188_v18 }
 0x13a   :  { %v192_v22 = vsel %vm179_vm15, %v186_v19, %v191_v20 }
 0x13b   :  { %v193_v23 = vadd.f32 %v192_v22, %v176_v12 }
 0x13d   :  { %v195_v24 = vsub.f32 %v194_v21, %v193_v23 }
 0x13f   :  { %196 = vst [vmem:[#allocation7] sm:$0xff] %v195_v24 }
 0x140   :  { %292 = shalt.err (!%p289_p0)
}
 0x141   :  { %206 = dma.vmem_to_hbm [thread:$0]  %s204_s22, 128, %s376_s2, [#allocation4]  }
 0x142   :  { %305 = dma.done.wait [#allocation4], 128  }
 0x143   :  { %306 = vsyncadd [#allocation4], 4294967168 }
 0x144   :  { %210 = vsyncpa [#allocation3], 1 }
 0x145   :  { %211 = vsyncpa [#allocation4], 1 }
 0x146   :  { %212 = vsyncpa [#allocation5], 1 }

</bundles_post_ra>
